<compile_context>
chip_gen: v6e
topology: v6e:2x2x1
jax: 0.10.0
libtpu: 0.0.40
codegen_flags: <defaults>
</compile_context>

<pallas_src>
import functools

import jax
import jax.numpy as jnp
from jax.experimental import pallas as pl
from jax.experimental.pallas import tpu as pltpu

D_IN = 768
HIDDEN = 256


def _leaky_relu(x, slope=0.2):
    return jnp.where(x > 0, x, slope * x)


def discriminator_kernel(x_ref, w1_ref, b1_ref, w2_ref, b2_ref, w3_ref, b3_ref,
                         o_ref):
    """Fused MLP on one (batch_tile, 768) bf16 tile resident in VMEM:
    Linear(768,256) -> LeakyReLU(0.2) -> Linear(256,256) -> LeakyReLU(0.2)
    -> Linear(256,1) -> Sigmoid.

    Layers 1/2 run on the MXU as bf16 x bf16 -> f32 accumulate; biases,
    activations and the sigmoid stay f32.  Layer 3 has a single output
    feature, so it is a VPU broadcast-multiply + XLU lane reduce written
    straight to a (batch_tile, 1) block (output traffic is ~0.1% of the
    input traffic, so no lane-dense relayout is worth its latency here).
    """
    x = x_ref[...]                                                   # (bt, 768) bf16
    h1 = jnp.dot(x, w1_ref[...],
                 preferred_element_type=jnp.float32) + b1_ref[...]  # (bt, 256) f32
    h1 = _leaky_relu(h1)
    h2 = jnp.dot(h1.astype(jnp.bfloat16), w2_ref[...],
                 preferred_element_type=jnp.float32) + b2_ref[...]  # (bt, 256) f32
    h2 = _leaky_relu(h2)
    # Layer 3 (out_features == 1): row-wise dot with a single f32 weight row.
    h3 = jnp.sum(h2 * w3_ref[...], axis=-1, keepdims=True) + b3_ref[...]  # (bt, 1)
    o_ref[...] = jax.nn.sigmoid(h3).astype(o_ref.dtype)


def _round_up(n, m):
    return ((n + m - 1) // m) * m


def _tpu_generation():
    """Best-effort chip query -> (multi_tensorcore, vmem_limit_bytes)."""
    try:
        kind = jax.devices()[0].device_kind.lower()
    except Exception:
        kind = ""
    multi_tc = ("v7" in kind) or ("7x" in kind)       # v7x: 2 TensorCores/chip
    # v7x: 64 MiB physical VMEM per TC -> stay at the 32 MiB scoped default.
    # v5e/v6e: 128 MiB physical (v5e's scoped default is only 16 MiB, so an
    # explicit limit is required for 4096-row tiles).
    vmem_limit = (32 << 20) if multi_tc else (48 << 20)
    return multi_tc, vmem_limit


def _auto_batch_tile(B, multi_tc):
    """Pick the per-grid-step batch tile (always a multiple of 8).

    Single-TC chips (v5e/v6e): splitting a few-microsecond kernel only adds
    ~0.35 us/step of pipeline overhead, so use one tile up to a 4096-row cap
    (bf16 x tile = 6 MiB per buffer), splitting as evenly as possible above
    the cap.  v7x (2 TCs): aim for an even number of steps, >=4 for large
    batches so each core gets >=2 steps and BlockSpec double-buffering hides
    the x-tile DMA; cap at 2048 rows for the 64 MiB-per-TC VMEM budget.
    """
    B = max(B, 1)
    if not multi_tc:
        if B <= 4096:
            return _round_up(B, 8)
        n = pl.cdiv(B, 4096)
        return _round_up(pl.cdiv(B, n), 8)
    if B <= 64:
        n = 2
    else:
        n = max(4, 2 * pl.cdiv(pl.cdiv(B, 2048), 2))   # even, tile <= 2048
    return min(2048, _round_up(pl.cdiv(B, n), 8))


@functools.partial(jax.jit, static_argnames=("batch_tile",))
def discriminator_forward(x, params, batch_tile=None):
    """x: (B, 768) float32 or bfloat16 -> (B, 1) float32.

    For peak throughput pass x as bfloat16 (the cast then fuses with the
    upstream producer); an f32 input is cast here at the cost of one extra
    HBM pass outside the kernel.
    """
    w1, b1, w2, b2, w3, b3 = params
    B, d_in = x.shape
    assert d_in == D_IN
    H = w1.shape[1]                                     # 256

    multi_tc, vmem_limit = _tpu_generation()
    if batch_tile is None:
        batch_tile = _auto_batch_tile(B, multi_tc)
    assert batch_tile % 8 == 0, "batch_tile must be a multiple of 8"
    num_tiles = pl.cdiv(B, batch_tile)
    padded_B = num_tiles * batch_tile

    # bf16 operands for the MXU / the x HBM stream; f32 everywhere else.
    x = x.astype(jnp.bfloat16)
    if padded_B != B:
        x = jnp.pad(x, ((0, padded_B - B), (0, 0)))
    w1_bf16 = w1.astype(jnp.bfloat16)
    w2_bf16 = w2.astype(jnp.bfloat16)
    b1_2d = b1.reshape(1, H).astype(jnp.float32)
    b2_2d = b2.reshape(1, H).astype(jnp.float32)
    w3_row = w3.reshape(1, H).astype(jnp.float32)       # (256,1) -> (1,256) row
    b3_2d = b3.reshape(1, 1).astype(jnp.float32)

    # Grid-invariant operands (constant index_map): single-buffer them so the
    # ~0.5 MiB of weights is not pointlessly double-buffered.
    def const_spec(shape):
        return pl.BlockSpec(shape, lambda i: (0, 0),
                            pipeline_mode=pl.Buffered(1))

    flops = 2 * padded_B * (D_IN * H + H * H + H)
    bytes_accessed = (padded_B * D_IN * 2 + padded_B * 4
                      + (D_IN * H + H * H) * 2 + (3 * H + 1) * 4)
    cost = pl.CostEstimate(flops=flops, transcendentals=padded_B,
                           bytes_accessed=bytes_accessed)

    out = pl.pallas_call(
        discriminator_kernel,
        out_shape=jax.ShapeDtypeStruct((padded_B, 1), jnp.float32),
        grid_spec=pltpu.PrefetchScalarGridSpec(
            num_scalar_prefetch=0,
            grid=(num_tiles,),
            in_specs=[
                pl.BlockSpec((batch_tile, D_IN), lambda i: (i, 0)),   # x (bf16)
                const_spec((D_IN, H)),        # w1 (bf16)
                const_spec((1, H)),           # b1 (f32)
                const_spec((H, H)),           # w2 (bf16)
                const_spec((1, H)),           # b2 (f32)
                const_spec((1, H)),           # w3 as a row (f32)
                const_spec((1, 1)),           # b3 (f32)
            ],
            out_specs=pl.BlockSpec((batch_tile, 1), lambda i: (i, 0)),
        ),
        compiler_params=pltpu.CompilerParams(
            dimension_semantics=("parallel",),
            vmem_limit_bytes=vmem_limit),
        cost_estimate=cost,
    )(x, w1_bf16, b1_2d, w2_bf16, b2_2d, w3_row, b3_2d)

    return out[:B]                                       # strip batch padding


def init_params(key):
    """Deterministic init mimicking torch.nn.Linear default U[-1/sqrt(fan_in), +]."""
    def linear(k, fan_in, fan_out):
        kw, kb = jax.random.split(k)
        bound = 1.0 / jnp.sqrt(fan_in)
        w = jax.random.uniform(kw, (fan_in, fan_out), jnp.float32, -bound, bound)
        b = jax.random.uniform(kb, (1, fan_out), jnp.float32, -bound, bound)
        return w, b

    k1, k2, k3 = jax.random.split(key, 3)
    w1, b1 = linear(k1, D_IN, HIDDEN)
    w2, b2 = linear(k2, HIDDEN, HIDDEN)
    w3, b3 = linear(k3, HIDDEN, 1)
    return (w1, b1, w2, b2, w3, b3)


def reference_forward(x, params):
    """Pure-f32 JAX reference matching the PyTorch module."""
    w1, b1, w2, b2, w3, b3 = params
    h = x @ w1 + b1
    h = jnp.maximum(h, 0.2 * h)
    h = h @ w2 + b2
    h = jnp.maximum(h, 0.2 * h)
    return jax.nn.sigmoid(h @ w3 + b3)


if __name__ == "__main__":
    key = jax.random.PRNGKey(0)
    kx, kp = jax.random.split(key)

    B = 16
    x = jax.random.normal(kx, (B, D_IN), dtype=jnp.float32)
    params = init_params(kp)

    out = discriminator_forward(x, params)
    out = jax.block_until_ready(out)

    ref = reference_forward(x, params)
    assert out.shape == (B, 1), out.shape
    # bf16 MXU operands with f32 accumulation: compare against the f32
    # reference with a bf16-appropriate tolerance.
    err = float(jnp.max(jnp.abs(out - ref)))
    assert jnp.allclose(out, ref, atol=2e-2, rtol=2e-2), f"mismatch, max abs err {err}"

    print("KERNEL_OK")
</pallas_src>

<mosaic_0001>
module attributes {stable_mosaic.version = 11 : i64} {
  func.func @discriminator_kernel(%arg0: i32, %arg1: memref<16x768xbf16, #tpu.memory_space<vmem>>, %arg2: memref<768x256xbf16, #tpu.memory_space<vmem>>, %arg3: memref<1x256xf32, #tpu.memory_space<vmem>>, %arg4: memref<256x256xbf16, #tpu.memory_space<vmem>>, %arg5: memref<1x256xf32, #tpu.memory_space<vmem>>, %arg6: memref<1x256xf32, #tpu.memory_space<vmem>>, %arg7: memref<1x1xf32, #tpu.memory_space<vmem>>, %arg8: memref<16x1xf32, #tpu.memory_space<vmem>>) attributes {dimension_semantics = [#tpu.dimension_semantics<parallel>], iteration_bounds = array<i64: 1>, scalar_prefetch = 0 : i64, scratch_operands = 0 : i64, tpu.core_type = #tpu.core_type<tc>, window_params = [{transform_indices = @transform_0, window_bounds = array<i64: 16, 768>}, {pipeline_mode = #tpu.pipeline_mode<synchronous>, transform_indices = @transform_1, window_bounds = array<i64: 768, 256>}, {pipeline_mode = #tpu.pipeline_mode<synchronous>, transform_indices = @transform_2, window_bounds = array<i64: 1, 256>}, {pipeline_mode = #tpu.pipeline_mode<synchronous>, transform_indices = @transform_3, window_bounds = array<i64: 256, 256>}, {pipeline_mode = #tpu.pipeline_mode<synchronous>, transform_indices = @transform_4, window_bounds = array<i64: 1, 256>}, {pipeline_mode = #tpu.pipeline_mode<synchronous>, transform_indices = @transform_5, window_bounds = array<i64: 1, 256>}, {pipeline_mode = #tpu.pipeline_mode<synchronous>, transform_indices = @transform_6, window_bounds = array<i64: 1, 1>}, {transform_indices = @transform_7, window_bounds = array<i64: 16, 1>}]} {
    %c0 = arith.constant 0 : index
    %c0_0 = arith.constant 0 : index
    %0 = vector.load %arg1[%c0, %c0_0] : memref<16x768xbf16, #tpu.memory_space<vmem>>, vector<16x768xbf16>
    %c0_1 = arith.constant 0 : index
    %c0_2 = arith.constant 0 : index
    %1 = vector.load %arg2[%c0_1, %c0_2] : memref<768x256xbf16, #tpu.memory_space<vmem>>, vector<768x256xbf16>
    %cst = arith.constant dense<0.000000e+00> : vector<16x256xf32>
    %2 = tpu.matmul %0, %1, %cst {dimension_numbers = #tpu.dot_dimension_numbers<[1], [0], [0], [1], [0, 0, 1, 1], [], []>} : vector<16x768xbf16>, vector<768x256xbf16>, vector<16x256xf32> -> vector<16x256xf32>
    %c0_3 = arith.constant 0 : index
    %c0_4 = arith.constant 0 : index
    %3 = vector.load %arg3[%c0_3, %c0_4] : memref<1x256xf32, #tpu.memory_space<vmem>>, vector<1x256xf32>
    %4 = vector.broadcast %3 : vector<1x256xf32> to vector<16x256xf32>
    %5 = arith.addf %2, %4 : vector<16x256xf32>
    %cst_5 = arith.constant 0.000000e+00 : f32
    %6 = vector.broadcast %cst_5 : f32 to vector<16x256xf32>
    %7 = arith.cmpf ogt, %5, %6 : vector<16x256xf32>
    %cst_6 = arith.constant 2.000000e-01 : f32
    %8 = vector.broadcast %cst_6 : f32 to vector<16x256xf32>
    %9 = arith.mulf %8, %5 : vector<16x256xf32>
    %10 = arith.select %7, %5, %9 : vector<16x256xi1>, vector<16x256xf32>
    %11 = arith.truncf %10 : vector<16x256xf32> to vector<16x256xbf16>
    %c0_7 = arith.constant 0 : index
    %c0_8 = arith.constant 0 : index
    %12 = vector.load %arg4[%c0_7, %c0_8] : memref<256x256xbf16, #tpu.memory_space<vmem>>, vector<256x256xbf16>
    %cst_9 = arith.constant dense<0.000000e+00> : vector<16x256xf32>
    %13 = tpu.matmul %11, %12, %cst_9 {dimension_numbers = #tpu.dot_dimension_numbers<[1], [0], [0], [1], [0, 0, 1, 1], [], []>} : vector<16x256xbf16>, vector<256x256xbf16>, vector<16x256xf32> -> vector<16x256xf32>
    %c0_10 = arith.constant 0 : index
    %c0_11 = arith.constant 0 : index
    %14 = vector.load %arg5[%c0_10, %c0_11] : memref<1x256xf32, #tpu.memory_space<vmem>>, vector<1x256xf32>
    %15 = vector.broadcast %14 : vector<1x256xf32> to vector<16x256xf32>
    %16 = arith.addf %13, %15 : vector<16x256xf32>
    %cst_12 = arith.constant 0.000000e+00 : f32
    %17 = vector.broadcast %cst_12 : f32 to vector<16x256xf32>
    %18 = arith.cmpf ogt, %16, %17 : vector<16x256xf32>
    %cst_13 = arith.constant 2.000000e-01 : f32
    %19 = vector.broadcast %cst_13 : f32 to vector<16x256xf32>
    %20 = arith.mulf %19, %16 : vector<16x256xf32>
    %21 = arith.select %18, %16, %20 : vector<16x256xi1>, vector<16x256xf32>
    %c0_14 = arith.constant 0 : index
    %c0_15 = arith.constant 0 : index
    %22 = vector.load %arg6[%c0_14, %c0_15] : memref<1x256xf32, #tpu.memory_space<vmem>>, vector<1x256xf32>
    %23 = vector.broadcast %22 : vector<1x256xf32> to vector<16x256xf32>
    %24 = arith.mulf %21, %23 : vector<16x256xf32>
    %cst_16 = arith.constant dense<0.000000e+00> : vector<16xf32>
    %25 = vector.multi_reduction <add>, %24, %cst_16 [1] : vector<16x256xf32> to vector<16xf32>
    %26 = vector.shape_cast %25 : vector<16xf32> to vector<16x1xf32>
    %c0_17 = arith.constant 0 : index
    %c0_18 = arith.constant 0 : index
    %27 = vector.load %arg7[%c0_17, %c0_18] : memref<1x1xf32, #tpu.memory_space<vmem>>, vector<1x1xf32>
    %28 = vector.broadcast %27 : vector<1x1xf32> to vector<16x1xf32>
    %29 = arith.addf %26, %28 : vector<16x1xf32>
    %30 = arith.negf %29 : vector<16x1xf32>
    %31 = math.exp %30 : vector<16x1xf32>
    %cst_19 = arith.constant 1.000000e+00 : f32
    %32 = vector.broadcast %cst_19 : f32 to vector<16x1xf32>
    %33 = arith.addf %32, %31 : vector<16x1xf32>
    %34 = arith.divf %32, %33 : vector<16x1xf32>
    %c0_20 = arith.constant 0 : index
    %c0_21 = arith.constant 0 : index
    %35 = vector.load %arg8[%c0_20, %c0_21] : memref<16x1xf32, #tpu.memory_space<vmem>>, vector<16x1xf32>
    tpu.vector_store %arg8[%c0_20, %c0_21], %34 {strides = array<i32>} : memref<16x1xf32, #tpu.memory_space<vmem>>, vector<16x1xf32>,
    return
  }
  func.func @transform_0(%arg0: i32) -> (i32, i32) {
    %c0_i32 = arith.constant 0 : i32
    %c0_i32_0 = arith.constant 0 : i32
    return %arg0, %c0_i32 : i32, i32
  }
  func.func @transform_1(%arg0: i32) -> (i32, i32) {
    %c0_i32 = arith.constant 0 : i32
    %c0_i32_0 = arith.constant 0 : i32
    %c0_i32_1 = arith.constant 0 : i32
    return %c0_i32, %c0_i32_0 : i32, i32
  }
  func.func @transform_2(%arg0: i32) -> (i32, i32) {
    %c0_i32 = arith.constant 0 : i32
    %c0_i32_0 = arith.constant 0 : i32
    %c0_i32_1 = arith.constant 0 : i32
    return %c0_i32, %c0_i32_0 : i32, i32
  }
  func.func @transform_3(%arg0: i32) -> (i32, i32) {
    %c0_i32 = arith.constant 0 : i32
    %c0_i32_0 = arith.constant 0 : i32
    %c0_i32_1 = arith.constant 0 : i32
    return %c0_i32, %c0_i32_0 : i32, i32
  }
  func.func @transform_4(%arg0: i32) -> (i32, i32) {
    %c0_i32 = arith.constant 0 : i32
    %c0_i32_0 = arith.constant 0 : i32
    %c0_i32_1 = arith.constant 0 : i32
    return %c0_i32, %c0_i32_0 : i32, i32
  }
  func.func @transform_5(%arg0: i32) -> (i32, i32) {
    %c0_i32 = arith.constant 0 : i32
    %c0_i32_0 = arith.constant 0 : i32
    %c0_i32_1 = arith.constant 0 : i32
    return %c0_i32, %c0_i32_0 : i32, i32
  }
  func.func @transform_6(%arg0: i32) -> (i32, i32) {
    %c0_i32 = arith.constant 0 : i32
    %c0_i32_0 = arith.constant 0 : i32
    %c0_i32_1 = arith.constant 0 : i32
    return %c0_i32, %c0_i32_0 : i32, i32
  }
  func.func @transform_7(%arg0: i32) -> (i32, i32) {
    %c0_i32 = arith.constant 0 : i32
    %c0_i32_0 = arith.constant 0 : i32
    return %arg0, %c0_i32 : i32, i32
  }
}

</mosaic_0001>

<bundles_post_ra>
// kernel: discriminator_forward.1
= control target key start
LH: loop header
LB: loop body
LE: loop exit
PB: predicated region body
PF: predicated region fallthrough
CT: control target
= control target key end

     0   :  { %vm1097_vm8 = vcmask 7168   ;;  %s1910_s1 = inlined_call_operand.vmem [shape: bf16[768,256], index: 1, kind: input, shape index: {}]   ;;  %s1911_s0 = inlined_call_operand.vmem [shape: bf16[16,768], index: 0, kind: input, shape index: {}]   ;;  %s1912_s3 = inlined_call_operand.vmem [shape: bf16[256,256], index: 3, kind: input, shape index: {}]   ;;  %s1913_s2 = inlined_call_operand.vmem [shape: f32[1,256], index: 2, kind: input, shape index: {}]   ;;  %s1914_s6 = inlined_call_operand.<no memory space> [shape: f32[1,1], index: 6, kind: input, shape index: {}]   ;;  %s1915_s4 = inlined_call_operand.vmem [shape: f32[1,256], index: 4, kind: input, shape index: {}]   ;;  %s1916_s5 = inlined_call_operand.vmem [shape: f32[1,256], index: 5, kind: input, shape index: {}]   ;;  %s1917_s7 = inlined_call_operand.vmem [shape: f32[16,1], index: 7, kind: output, shape index: {}]  }
   0x1   :  { %v1241_v0 = vld [vmem:[%s1910_s1 + $0x74] ss:$8 sps:$4 sm:$0xff]   ;;  %v1243_v1 = vld [vmem:[%s1910_s1 + $0x70] ss:$8 sps:$4 sm:$0xff]   ;;  %v1247_v4 = vld [vmem:[%s1910_s1 + $0x64] ss:$8 sps:$4 sm:$0xff]  }
   0x2   :  { %652 = vmatprep.subr.bf16.mxu0 %v1241_v0  ;;  %v1244_v2 = vld [vmem:[%s1910_s1 + $0x174] ss:$8 sps:$4 sm:$0xff]   ;;  %v1246_v3 = vld [vmem:[%s1910_s1 + $0x170] ss:$8 sps:$4 sm:$0xff]   ;;  %v1249_v5 = vld [vmem:[%s1910_s1 + $0x60] ss:$8 sps:$4 sm:$0xff]  }
   0x3   :  { %653 = vmatpush1.bf16.msra.mxu0 %v1243_v1  ;;  %695 = vmatprep.subr.bf16.mxu1 %v1244_v2  ;;  %v1250_v6 = vld [vmem:[%s1910_s1 + $0x164] ss:$8 sps:$4 sm:$0xff]   ;;  %v1252_v7 = vld [vmem:[%s1910_s1 + $0x160] ss:$8 sps:$4 sm:$0xff]   ;;  %v1253_v8 = vld [vmem:[%s1910_s1 + $0x54] ss:$8 sps:$4 sm:$0xff]  }
   0x4   :  { %696 = vmatpush1.bf16.msra.mxu1 %v1246_v3  ;;  %654 = vmatprep.subr.bf16.mxu0 %v1247_v4  ;;  %v1255_v9 = vld [vmem:[%s1910_s1 + $0x50] ss:$8 sps:$4 sm:$0xff]   ;;  %v1256_v10 = vld [vmem:[%s1910_s1 + $0x154] ss:$8 sps:$4 sm:$0xff]   ;;  %v1259_v11 = vld [vmem:[%s1910_s1 + $0x44] ss:$8 sps:$4 sm:$0xff]  }
   0x5   :  { %697 = vmatprep.subr.bf16.mxu1 %v1250_v6  ;;  %v1258_v12 = vld [vmem:[%s1910_s1 + $0x150] ss:$8 sps:$4 sm:$0xff]   ;;  %v1262_v13 = vld [vmem:[%s1910_s1 + $0x144] ss:$8 sps:$4 sm:$0xff]   ;;  %v1261_v14 = vld [vmem:[%s1910_s1 + $0x40] ss:$8 sps:$4 sm:$0xff]  }
   0x6   :  { %v1265_v15 = vld [vmem:[%s1910_s1 + $0x34] ss:$8 sps:$4 sm:$0xff]   ;;  %v1264_v16 = vld [vmem:[%s1910_s1 + $0x140] ss:$8 sps:$4 sm:$0xff]   ;;  %v1267_v18 = vld [vmem:[%s1910_s1 + $0x30] ss:$8 sps:$4 sm:$0xff]  }
   0x7   :  { %655 = vmatpush1.bf16.msra.mxu0 %v1249_v5  ;;  %v1268_v17 = vld [vmem:[%s1910_s1 + $0x134] ss:$8 sps:$4 sm:$0xff]   ;;  %v1271_v19 = vld [vmem:[%s1910_s1 + $0x24] ss:$8 sps:$4 sm:$0xff]   ;;  %v1270_v20 = vld [vmem:[%s1910_s1 + $0x130] ss:$8 sps:$4 sm:$0xff]  }
   0x8   :  { %656 = vmatprep.subr.bf16.mxu0 %v1253_v8  ;;  %698 = vmatpush1.bf16.msra.mxu1 %v1252_v7  ;;  %v1274_v21 = vld [vmem:[%s1910_s1 + $0x124] ss:$8 sps:$4 sm:$0xff]   ;;  %v1273_v22 = vld [vmem:[%s1910_s1 + $0x20] ss:$8 sps:$4 sm:$0xff]   ;;  %v1277_v23 = vld [vmem:[%s1910_s1 + $0x14] ss:$8 sps:$4 sm:$0xff]  }
   0x9   :  { %699 = vmatprep.subr.bf16.mxu1 %v1256_v10  ;;  %v1276_v24 = vld [vmem:[%s1910_s1 + $0x120] ss:$8 sps:$4 sm:$0xff]   ;;  %v1280_v25 = vld [vmem:[%s1910_s1 + $0x114] ss:$8 sps:$4 sm:$0xff]   ;;  %v1279_v26 = vld [vmem:[%s1910_s1 + $0x10] ss:$8 sps:$4 sm:$0xff]  }
   0xa   :  { %v1283_v27 = vld [vmem:[%s1910_s1 + $0x4] ss:$8 sps:$4 sm:$0xff]   ;;  %v1282_v28 = vld [vmem:[%s1910_s1 + $0x110] ss:$8 sps:$4 sm:$0xff]   ;;  %v1285_v30 = vld [vmem:[%s1910_s1] ss:$8 sps:$4 sm:$0xff]  }
   0xb   :  { %657 = vmatpush1.bf16.msra.mxu0 %v1255_v9  ;;  %v1286_v29 = vld [vmem:[%s1910_s1 + $0x104] ss:$8 sps:$4 sm:$0xff]   ;;  %v1289_v31 = vld [vmem:[%s1910_s1 + $0xf4] ss:$8 sps:$4 sm:$0xff]   ;;  %v1288_v32 = vld [vmem:[%s1910_s1 + $0x100] ss:$8 sps:$4 sm:$0xff]  }
   0xc   :  { %658 = vmatprep.subr.bf16.mxu0 %v1259_v11  ;;  %700 = vmatpush1.bf16.msra.mxu1 %v1258_v12  ;;  %v1292_v33 = vld [vmem:[%s1910_s1 + $0x1f4] ss:$8 sps:$4 sm:$0xff]   ;;  %v1291_v34 = vld [vmem:[%s1910_s1 + $0xf0] ss:$8 sps:$4 sm:$0xff]   ;;  %v1295_v35 = vld [vmem:[%s1910_s1 + $0xe4] ss:$8 sps:$4 sm:$0xff]  }
   0xd   :  { %701 = vmatprep.subr.bf16.mxu1 %v1262_v13  ;;  %v1294_v36 = vld [vmem:[%s1910_s1 + $0x1f0] ss:$8 sps:$4 sm:$0xff]   ;;  %v1298_v37 = vld [vmem:[%s1910_s1 + $0x1e4] ss:$8 sps:$4 sm:$0xff]   ;;  %v1297_v38 = vld [vmem:[%s1910_s1 + $0xe0] ss:$8 sps:$4 sm:$0xff]  }
   0xe   :  { %v1301_v39 = vld [vmem:[%s1910_s1 + $0xd4] ss:$8 sps:$4 sm:$0xff]   ;;  %v1300_v40 = vld [vmem:[%s1910_s1 + $0x1e0] ss:$8 sps:$4 sm:$0xff]   ;;  %v1303_v42 = vld [vmem:[%s1910_s1 + $0xd0] ss:$8 sps:$4 sm:$0xff]  }
   0xf   :  { %659 = vmatpush1.bf16.msra.mxu0 %v1261_v14  ;;  %v1304_v41 = vld [vmem:[%s1910_s1 + $0x1d4] ss:$8 sps:$4 sm:$0xff]   ;;  %v1307_v43 = vld [vmem:[%s1910_s1 + $0xc4] ss:$8 sps:$4 sm:$0xff]   ;;  %v1306_v44 = vld [vmem:[%s1910_s1 + $0x1d0] ss:$8 sps:$4 sm:$0xff]  }
  0x10   :  { %660 = vmatprep.subr.bf16.mxu0 %v1265_v15  ;;  %702 = vmatpush1.bf16.msra.mxu1 %v1264_v16  ;;  %v1310_v45 = vld [vmem:[%s1910_s1 + $0x1c4] ss:$8 sps:$4 sm:$0xff]   ;;  %v1309_v46 = vld [vmem:[%s1910_s1 + $0xc0] ss:$8 sps:$4 sm:$0xff]   ;;  %v1313_v48 = vld [vmem:[%s1910_s1 + $0xb4] ss:$8 sps:$4 sm:$0xff]  }
  0x11   :  { %703 = vmatprep.subr.bf16.mxu1 %v1268_v17  ;;  %v1338_v47 = vld [vmem:[%s1911_s0 + $0x4] ss:$24 sps:$4 sm:$0xff]   ;;  %v1312_v49 = vld [vmem:[%s1910_s1 + $0x1c0] ss:$8 sps:$4 sm:$0xff]   ;;  %v1315_v52 = vld [vmem:[%s1910_s1 + $0xb0] ss:$8 sps:$4 sm:$0xff]  }
  0x12   :  { %684 = vmatprep.mubr.bf16.mxu0 %v1338_v47  ;;  %v1316_v50 = vld [vmem:[%s1910_s1 + $0x1b4] ss:$8 sps:$4 sm:$0xff]   ;;  %v1345_v51 = vld [vmem:[%s1911_s0 + $0xc] ss:$24 sps:$4 sm:$0xff]   ;;  %v1318_v54 = vld [vmem:[%s1910_s1 + $0x1b0] ss:$8 sps:$4 sm:$0xff]  }
  0x13   :  { %661 = vmatpush1.bf16.msra.mxu0 %v1267_v18  ;;  %v1319_v53 = vld [vmem:[%s1910_s1 + $0xa4] ss:$8 sps:$4 sm:$0xff]   ;;  %727 = vmatprep.mubr.bf16.mxu1 %v1345_v51  ;;  %v1321_v56 = vld [vmem:[%s1910_s1 + $0xa0] ss:$8 sps:$4 sm:$0xff]   ;;  %v1325_v57 = vld [vmem:[%s1910_s1 + $0x94] ss:$8 sps:$4 sm:$0xff]  }
  0x14   :  { %662 = vmatprep.subr.bf16.mxu0 %v1271_v19  ;;  %704 = vmatpush1.bf16.msra.mxu1 %v1270_v20  ;;  %v1322_v55 = vld [vmem:[%s1910_s1 + $0x1a4] ss:$8 sps:$4 sm:$0xff]   ;;  %v1324_v58 = vld [vmem:[%s1910_s1 + $0x1a0] ss:$8 sps:$4 sm:$0xff]   ;;  %v1328_v59 = vld [vmem:[%s1910_s1 + $0x194] ss:$8 sps:$4 sm:$0xff]  }
  0x15   :  { %705 = vmatprep.subr.bf16.mxu1 %v1274_v21  ;;  %v1327_v60 = vld [vmem:[%s1910_s1 + $0x90] ss:$8 sps:$4 sm:$0xff]   ;;  %v1331_v61 = vld [vmem:[%s1910_s1 + $0x84] ss:$8 sps:$4 sm:$0xff]   ;;  %v1333_v0 = vld [vmem:[%s1910_s1 + $0x80] ss:$8 sps:$4 sm:$0xff]  }
  0x16   :  { %v1330_v62 = vld [vmem:[%s1910_s1 + $0x190] ss:$8 sps:$4 sm:$0xff]   ;;  %v1334_v63 = vld [vmem:[%s1910_s1 + $0x184] ss:$8 sps:$4 sm:$0xff]   ;;  %v1342_v1 = vld [vmem:[%s1910_s1 + $0x274] ss:$8 sps:$4 sm:$0xff]  }
  0x17   :  { %663 = vmatpush1.bf16.msra.mxu0 %v1273_v22  ;;  %v1339_v2 = vld [vmem:[%s1910_s1 + $0x180] ss:$8 sps:$4 sm:$0xff]   ;;  %v1340_v4 = vld [vmem:[%s1910_s1 + $0x270] ss:$8 sps:$4 sm:$0xff]   ;;  %v1348_v6 = vld [vmem:[%s1910_s1 + $0x264] ss:$8 sps:$4 sm:$0xff]  }
  0x18   :  { %664 = vmatprep.subr.bf16.mxu0 %v1277_v23  ;;  %706 = vmatpush1.bf16.msra.mxu1 %v1276_v24  ;;  %v1336_v3 = vld [vmem:[%s1911_s0] ss:$24 sps:$4 sm:$0xff]   ;;  %v1393_v8 = vld [vmem:[%s1911_s0 + $0x14] ss:$24 sps:$4 sm:$0xff]  }
  0x19   :  { %707 = vmatprep.subr.bf16.mxu1 %v1280_v25  ;;  %v1343_v5 = vld [vmem:[%s1911_s0 + $0x8] ss:$24 sps:$4 sm:$0xff]   ;;  %v1351_v9 = vld [vmem:[%s1910_s1 + $0x254] ss:$8 sps:$4 sm:$0xff]   ;;  %v1349_v10 = vld [vmem:[%s1910_s1 + $0x250] ss:$8 sps:$4 sm:$0xff]  }
  0x1a   :  { %v1346_v7 = vld [vmem:[%s1910_s1 + $0x260] ss:$8 sps:$4 sm:$0xff]   ;;  %v1354_v11 = vld [vmem:[%s1910_s1 + $0x244] ss:$8 sps:$4 sm:$0xff]   ;;  %v1357_v13 = vld [vmem:[%s1910_s1 + $0x234] ss:$8 sps:$4 sm:$0xff]  }
  0x1b   :  { %665 = vmatpush1.bf16.msra.mxu0 %v1279_v26  ;;  %v1352_v12 = vld [vmem:[%s1910_s1 + $0x240] ss:$8 sps:$4 sm:$0xff]   ;;  %v1355_v14 = vld [vmem:[%s1910_s1 + $0x230] ss:$8 sps:$4 sm:$0xff]   ;;  %v1360_v15 = vld [vmem:[%s1910_s1 + $0x224] ss:$8 sps:$4 sm:$0xff]  }
  0x1c   :  { %666 = vmatprep.subr.bf16.mxu0 %v1283_v27  ;;  %708 = vmatpush1.bf16.msra.mxu1 %v1282_v28  ;;  %v1358_v16 = vld [vmem:[%s1910_s1 + $0x220] ss:$8 sps:$4 sm:$0xff]   ;;  %v1363_v17 = vld [vmem:[%s1910_s1 + $0x214] ss:$8 sps:$4 sm:$0xff]   ;;  %v1361_v18 = vld [vmem:[%s1910_s1 + $0x210] ss:$8 sps:$4 sm:$0xff]  }
  0x1d   :  { %709 = vmatprep.subr.bf16.mxu1 %v1286_v29  ;;  %v1366_v19 = vld [vmem:[%s1910_s1 + $0x204] ss:$8 sps:$4 sm:$0xff]   ;;  %v1364_v20 = vld [vmem:[%s1910_s1 + $0x200] ss:$8 sps:$4 sm:$0xff]   ;;  %v1369_v21 = vld [vmem:[%s1910_s1 + $0x2f4] ss:$8 sps:$4 sm:$0xff]  }
  0x1e   :  { %v1367_v22 = vld [vmem:[%s1910_s1 + $0x2f0] ss:$8 sps:$4 sm:$0xff]   ;;  %v1372_v23 = vld [vmem:[%s1910_s1 + $0x2e4] ss:$8 sps:$4 sm:$0xff]   ;;  %v1370_v24 = vld [vmem:[%s1910_s1 + $0x2e0] ss:$8 sps:$4 sm:$0xff]  }
  0x1f   :  { %667 = vmatpush1.bf16.msra.mxu0 %v1285_v30  ;;  %v1375_v25 = vld [vmem:[%s1910_s1 + $0x2d4] ss:$8 sps:$4 sm:$0xff]   ;;  %v1373_v26 = vld [vmem:[%s1910_s1 + $0x2d0] ss:$8 sps:$4 sm:$0xff]   ;;  %v1378_v27 = vld [vmem:[%s1910_s1 + $0x2c4] ss:$8 sps:$4 sm:$0xff]  }
  0x20   :  { %668 = vmatprep.subr.bf16.mxu0 %v1289_v31  ;;  %710 = vmatpush1.bf16.msra.mxu1 %v1288_v32  ;;  %v1376_v28 = vld [vmem:[%s1910_s1 + $0x2c0] ss:$8 sps:$4 sm:$0xff]   ;;  %v1381_v29 = vld [vmem:[%s1910_s1 + $0x2b4] ss:$8 sps:$4 sm:$0xff]   ;;  %v1379_v30 = vld [vmem:[%s1910_s1 + $0x2b0] ss:$8 sps:$4 sm:$0xff]  }
  0x21   :  { %711 = vmatprep.subr.bf16.mxu1 %v1292_v33  ;;  %v1384_v31 = vld [vmem:[%s1910_s1 + $0x2a4] ss:$8 sps:$4 sm:$0xff]   ;;  %v1382_v32 = vld [vmem:[%s1910_s1 + $0x2a0] ss:$8 sps:$4 sm:$0xff]   ;;  %v1387_v33 = vld [vmem:[%s1910_s1 + $0x294] ss:$8 sps:$4 sm:$0xff]  }
  0x22   :  { %v1406_v47 = vld [vmem:[%s1912_s3 + $0x30] ss:$8 sps:$4 sm:$0xff]  }
  0x23   :  { %669 = vmatpush2.bf16.msra.mxu0 %v1291_v34  ;;  %v1385_v34 = vld [vmem:[%s1910_s1 + $0x290] ss:$8 sps:$4 sm:$0xff]  }
  0x24   :  { %670 = vmatprep.subr.bf16.mxu0 %v1295_v35  ;;  %712 = vmatpush2.bf16.msra.mxu1 %v1294_v36  ;;  %v1390_v35 = vld [vmem:[%s1910_s1 + $0x284] ss:$8 sps:$4 sm:$0xff]   ;;  %v1388_v36 = vld [vmem:[%s1910_s1 + $0x280] ss:$8 sps:$4 sm:$0xff]   ;;  %v1412_v51 = vld [vmem:[%s1912_s3 + $0x10] ss:$8 sps:$4 sm:$0xff]  }
  0x25   :  { %713 = vmatprep.subr.bf16.mxu1 %v1298_v37  ;;  %v1391_v37 = vld [vmem:[%s1911_s0 + $0x10] ss:$24 sps:$4 sm:$0xff]  }
  0x27   :  { %671 = vmatpush2.bf16.msra.mxu0 %v1297_v38  ;;  %v1394_v38 = vld [vmem:[%s1912_s3 + $0x70] ss:$8 sps:$4 sm:$0xff]  }
  0x28   :  { %672 = vmatprep.subr.bf16.mxu0 %v1301_v39  ;;  %714 = vmatpush2.bf16.msra.mxu1 %v1300_v40  ;;  %v1396_v39 = vld [vmem:[%s1912_s3 + $0x74] ss:$8 sps:$4 sm:$0xff]   ;;  %v1399_v40 = vld [vmem:[%s1912_s3 + $0x64] ss:$8 sps:$4 sm:$0xff]  }
  0x29   :  { %715 = vmatprep.subr.bf16.mxu1 %v1304_v41  ;;  %v1397_v41 = vld [vmem:[%s1912_s3 + $0x60] ss:$8 sps:$4 sm:$0xff]  }
  0x2b   :  { %673 = vmatpush2.bf16.msra.mxu0 %v1303_v42  ;;  %v1402_v42 = vld [vmem:[%s1912_s3 + $0x54] ss:$8 sps:$4 sm:$0xff]  }
  0x2c   :  { %674 = vmatprep.subr.bf16.mxu0 %v1307_v43  ;;  %716 = vmatpush2.bf16.msra.mxu1 %v1306_v44  ;;  %v1400_v43 = vld [vmem:[%s1912_s3 + $0x50] ss:$8 sps:$4 sm:$0xff]   ;;  %v1405_v44 = vld [vmem:[%s1912_s3 + $0x44] ss:$8 sps:$4 sm:$0xff]  }
  0x2d   :  { %717 = vmatprep.subr.bf16.mxu1 %v1310_v45  ;;  %v1403_v45 = vld [vmem:[%s1912_s3 + $0x40] ss:$8 sps:$4 sm:$0xff]  }
  0x2f   :  { %675 = vmatpush2.bf16.msra.mxu0 %v1309_v46  ;;  %v1408_v46 = vld [vmem:[%s1912_s3 + $0x34] ss:$8 sps:$4 sm:$0xff]  }
  0x30   :  { %676 = vmatprep.subr.bf16.mxu0 %v1313_v48  ;;  %718 = vmatpush2.bf16.msra.mxu1 %v1312_v49  ;;  %v1411_v48 = vld [vmem:[%s1912_s3 + $0x24] ss:$8 sps:$4 sm:$0xff]   ;;  %v1409_v49 = vld [vmem:[%s1912_s3 + $0x20] ss:$8 sps:$4 sm:$0xff]  }
  0x31   :  { %719 = vmatprep.subr.bf16.mxu1 %v1316_v50  ;;  %v1414_v50 = vld [vmem:[%s1912_s3 + $0x14] ss:$8 sps:$4 sm:$0xff]  }
  0x33   :  { %677 = vmatpush2.bf16.msra.mxu0 %v1315_v52  ;;  %v1417_v52 = vld [vmem:[%s1912_s3 + $0x4] ss:$8 sps:$4 sm:$0xff]  }
  0x34   :  { %678 = vmatprep.subr.bf16.mxu0 %v1319_v53  ;;  %720 = vmatpush2.bf16.msra.mxu1 %v1318_v54  ;;  %v1415_v53 = vld [vmem:[%s1912_s3] ss:$8 sps:$4 sm:$0xff]   ;;  %v1420_v54 = vld [vmem:[%s1912_s3 + $0xf4] ss:$8 sps:$4 sm:$0xff]  }
  0x35   :  { %721 = vmatprep.subr.bf16.mxu1 %v1322_v55  ;;  %v1418_v55 = vld [vmem:[%s1912_s3 + $0xf0] ss:$8 sps:$4 sm:$0xff]  }
  0x37   :  { %679 = vmatpush2.bf16.msra.mxu0 %v1321_v56  ;;  %v1423_v56 = vld [vmem:[%s1912_s3 + $0xe4] ss:$8 sps:$4 sm:$0xff]  }
  0x38   :  { %680 = vmatprep.subr.bf16.mxu0 %v1325_v57  ;;  %722 = vmatpush2.bf16.msra.mxu1 %v1324_v58  ;;  %v1421_v57 = vld [vmem:[%s1912_s3 + $0xe0] ss:$8 sps:$4 sm:$0xff]   ;;  %v1426_v58 = vld [vmem:[%s1912_s3 + $0xd4] ss:$8 sps:$4 sm:$0xff]  }
  0x39   :  { %723 = vmatprep.subr.bf16.mxu1 %v1328_v59  ;;  %v1424_v59 = vld [vmem:[%s1912_s3 + $0xd0] ss:$8 sps:$4 sm:$0xff]  }
  0x3b   :  { %681 = vmatpush2.bf16.msra.mxu0 %v1327_v60  ;;  %v1429_v60 = vld [vmem:[%s1912_s3 + $0xc4] ss:$8 sps:$4 sm:$0xff]  }
  0x3c   :  { %682 = vmatprep.subr.bf16.mxu0 %v1331_v61  ;;  %724 = vmatpush2.bf16.msra.mxu1 %v1330_v62  ;;  %v1427_v61 = vld [vmem:[%s1912_s3 + $0xc0] ss:$8 sps:$4 sm:$0xff]   ;;  %v1432_v62 = vld [vmem:[%s1912_s3 + $0xb4] ss:$8 sps:$4 sm:$0xff]  }
  0x3d   :  { %725 = vmatprep.subr.bf16.mxu1 %v1334_v63  ;;  %v1430_v63 = vld [vmem:[%s1912_s3 + $0xb0] ss:$8 sps:$4 sm:$0xff]  }
  0x3f   :  { %683 = vmatpush2.bf16.msra.mxu0 %v1333_v0  ;;  %v1435_v0 = vld [vmem:[%s1912_s3 + $0xa4] ss:$8 sps:$4 sm:$0xff]  }
  0x40   :  { %738 = vmatprep.subr.bf16.mxu0 %v1342_v1  ;;  %726 = vmatpush2.bf16.msra.mxu1 %v1339_v2  ;;  %v1433_v1 = vld [vmem:[%s1912_s3 + $0xa0] ss:$8 sps:$4 sm:$0xff]   ;;  %v1438_v2 = vld [vmem:[%s1912_s3 + $0x94] ss:$8 sps:$4 sm:$0xff]  }
  0x41   :  { %999 = vmatprep.subr.bf16.mxu1 %v1396_v39 }
  0x42   :  { %685 = vmatmul.mubr.bf16.vlgmr.msra.gmra.mxu0 %v1336_v3  ;;  %v1436_v3 = vld [vmem:[%s1912_s3 + $0x90] ss:$8 sps:$4 sm:$0xff]  }
  0x43   :  { %739 = vmatpush1.bf16.msra.mxu0 %v1340_v4  ;;  %728 = vmatmul.mubr.bf16.vlgmr.msra.gmra.mxu1 %v1343_v5  ;;  %v1441_v4 = vld [vmem:[%s1912_s3 + $0x84] ss:$8 sps:$4 sm:$0xff]   ;;  %v1439_v5 = vld [vmem:[%s1912_s3 + $0x80] ss:$8 sps:$4 sm:$0xff]  }
  0x44   :  { %740 = vmatprep.subr.bf16.mxu0 %v1348_v6  ;;  %770 = vmatprep.mubr.bf16.mxu0 %v1393_v8  ;;  %v132_v6 = vlaneseq }
  0x45   :  { %1000 = vmatpush1.bf16.msra.mxu1 %v1394_v38 }
  0x46   :  { %1001 = vmatprep.subr.bf16.mxu1 %v1399_v40 }
  0x47   :  { %741 = vmatpush1.bf16.msra.mxu0 %v1346_v7  ;;  %v133_v7 = vshrl.u32 %v132_v6, 7 }
  0x48   :  { %742 = vmatprep.subr.bf16.mxu0 %v1351_v9 }
  0x49   :  { %1002 = vmatpush1.bf16.msra.mxu1 %v1397_v41  ;;  %v138_v9 = vsub.s32 1, %v133_v7 }
  0x4a   :  { %1003 = vmatprep.subr.bf16.mxu1 %v1402_v42 }
  0x4b   :  { %743 = vmatpush1.bf16.msra.mxu0 %v1349_v10  ;;  %v130_v10 = vld [vmem:[%s1913_s2] sm:$0x3] }
  0x4c   :  { %744 = vmatprep.subr.bf16.mxu0 %v1354_v11  ;;  %v134_v11 = vsub.s32 0, %v133_v7 }
  0x4d   :  { %1004 = vmatpush1.bf16.msra.mxu1 %v1400_v43 }
  0x4e   :  { %1005 = vmatprep.subr.bf16.mxu1 %v1405_v44 }
  0x4f   :  { %745 = vmatpush1.bf16.msra.mxu0 %v1352_v12 }
  0x50   :  { %746 = vmatprep.subr.bf16.mxu0 %v1357_v13 }
  0x51   :  { %1006 = vmatpush1.bf16.msra.mxu1 %v1403_v45 }
  0x52   :  { %1007 = vmatprep.subr.bf16.mxu1 %v1408_v46 }
  0x53   :  { %747 = vmatpush1.bf16.msra.mxu0 %v1355_v14  ;;  %v139_v14 = vrot.slane %v130_v10, %v138_v9 }
  0x54   :  { %748 = vmatprep.subr.bf16.mxu0 %v1360_v15  ;;  %v135_v15 = vrot.slane %v130_v10, %v134_v11 }
  0x55   :  { %1008 = vmatpush1.bf16.msra.mxu1 %v1406_v47  ;;  %v12_v47 = vstv %s1914_s6 }
  0x56   :  { %1009 = vmatprep.subr.bf16.mxu1 %v1411_v48  ;;  %13 = vst [vmem:[#allocation2] sm:$0x1] %v12_v47  ;;  %v827_v48 = vld [vmem:[%s1915_s4] sm:$0x3] }
  0x57   :  { %749 = vmatpush1.bf16.msra.mxu0 %v1358_v16 }
  0x58   :  { %750 = vmatprep.subr.bf16.mxu0 %v1363_v17 }
  0x59   :  { %1010 = vmatpush1.bf16.msra.mxu1 %v1409_v49  ;;  %v832_v49 = vrot.slane %v827_v48, %v134_v11 }
  0x5a   :  { %1011 = vmatprep.subr.bf16.mxu1 %v1414_v50  ;;  %v836_v50 = vrot.slane %v827_v48, %v138_v9 }
  0x5b   :  { %751 = vmatpush1.bf16.msra.mxu0 %v1361_v18 }
  0x5c   :  { %752 = vmatprep.subr.bf16.mxu0 %v1366_v19 }
  0x5d   :  { %1012 = vmatpush1.bf16.msra.mxu1 %v1412_v51 }
  0x5e   :  { %1013 = vmatprep.subr.bf16.mxu1 %v1417_v52 }
  0x5f   :  { %753 = vmatpush1.bf16.msra.mxu0 %v1364_v20 }
  0x60   :  { %754 = vmatprep.subr.bf16.mxu0 %v1369_v21 }
  0x61   :  { %1014 = vmatpush1.bf16.msra.mxu1 %v1415_v53  ;;  %v1054_v53 = vld [vmem:[%s1916_s5] sm:$0x3] }
  0x62   :  { %1015 = vmatprep.subr.bf16.mxu1 %v1420_v54 }
  0x63   :  { %755 = vmatpush2.bf16.msra.mxu0 %v1367_v22 }
  0x64   :  { %756 = vmatprep.subr.bf16.mxu0 %v1372_v23 }
  0x65   :  { %1016 = vmatpush2.bf16.msra.mxu1 %v1418_v55 }
  0x66   :  { %1017 = vmatprep.subr.bf16.mxu1 %v1423_v56 }
  0x67   :  { %757 = vmatpush2.bf16.msra.mxu0 %v1370_v24 }
  0x68   :  { %758 = vmatprep.subr.bf16.mxu0 %v1375_v25 }
  0x69   :  { %1018 = vmatpush2.bf16.msra.mxu1 %v1421_v57 }
  0x6a   :  { %1019 = vmatprep.subr.bf16.mxu1 %v1426_v58  ;;  %v1059_v58 = vrot.slane %v1054_v53, %v134_v11 }
  0x6b   :  { %759 = vmatpush2.bf16.msra.mxu0 %v1373_v26 }
  0x6c   :  { %760 = vmatprep.subr.bf16.mxu0 %v1378_v27 }
  0x6d   :  { %1020 = vmatpush2.bf16.msra.mxu1 %v1424_v59  ;;  %v1063_v59 = vrot.slane %v1054_v53, %v138_v9 }
  0x6e   :  { %1021 = vmatprep.subr.bf16.mxu1 %v1429_v60 }
  0x6f   :  { %761 = vmatpush2.bf16.msra.mxu0 %v1376_v28 }
  0x70   :  { %762 = vmatprep.subr.bf16.mxu0 %v1381_v29 }
  0x71   :  { %1022 = vmatpush2.bf16.msra.mxu1 %v1427_v61 }
  0x72   :  { %1023 = vmatprep.subr.bf16.mxu1 %v1432_v62 }
  0x73   :  { %763 = vmatpush2.bf16.msra.mxu0 %v1379_v30 }
  0x74   :  { %764 = vmatprep.subr.bf16.mxu0 %v1384_v31 }
  0x75   :  { %1024 = vmatpush2.bf16.msra.mxu1 %v1430_v63 }
  0x76   :  { %1025 = vmatprep.subr.bf16.mxu1 %v1435_v0 }
  0x77   :  { %765 = vmatpush2.bf16.msra.mxu0 %v1382_v32 }
  0x78   :  { %766 = vmatprep.subr.bf16.mxu0 %v1387_v33 }
  0x79   :  { %1026 = vmatpush2.bf16.msra.mxu1 %v1433_v1 }
  0x7a   :  { %1027 = vmatprep.subr.bf16.mxu1 %v1438_v2 }
  0x7b   :  { %767 = vmatpush2.bf16.msra.mxu0 %v1385_v34 }
  0x7c   :  { %768 = vmatprep.subr.bf16.mxu0 %v1390_v35 }
  0x7d   :  { %1028 = vmatpush2.bf16.msra.mxu1 %v1436_v3 }
  0x7e   :  { %1029 = vmatprep.subr.bf16.mxu1 %v1441_v4 }
  0x7f   :  { %769 = vmatpush2.bf16.msra.mxu0 %v1388_v36 }
  0x81   :  { %1030 = vmatpush2.bf16.msra.mxu1 %v1439_v5 }
  0x82   :  { %771 = vmatmul.mubr.bf16.vlgmr.msra.gmra.mxu0 %v1391_v37 }
 0x102   :  { %v686_v8 = vpop.f32.mrf.mxu0 }
 0x103   :  { %v729_v13 = vpop.f32.mrf.mxu1  ;;  %v687_v19 = vadd.f32 %v686_v8, %v135_v15 }
 0x104   :  { %v688_v12 = vpop.f32.mrf.mxu0 }
 0x105   :  { %v731_v17 = vpop.f32.mrf.mxu1  ;;  %v689_v18 = vadd.f32 %v688_v12, %v139_v14  ;;  %v730_v26 = vadd.f32 %v729_v13, %v687_v19  ;;  %v1238_v12 = vld [vmem:[#allocation2] ss:$0 sm:$0xff] }
 0x106   :  { %v690_v16 = vpop.f32.mrf.mxu0 }
 0x107   :  { %v733_v21 = vpop.f32.mrf.mxu1  ;;  %v691_v22 = vadd.f32 %v690_v16, %v135_v15  ;;  %v732_v24 = vadd.f32 %v731_v17, %v689_v18 }
 0x108   :  { %v692_v20 = vpop.f32.mrf.mxu0 }
 0x109   :  { %v693_v25 = vadd.f32 %v692_v20, %v139_v14  ;;  %v735_v27 = vpop.f32.mrf.mxu1  ;;  %v734_v29 = vadd.f32 %v733_v21, %v691_v22 }
 0x10b   :  { %v736_v33 = vadd.f32 %v735_v27, %v693_v25 }
 0x142   :  { %v772_v23 = vpop.f32.mrf.mxu0 }
 0x143   :  { %v773_v31 = vadd.f32 %v772_v23, %v730_v26 }
 0x144   :  { %v774_v28 = vpop.f32.mrf.mxu0 }
 0x145   :  { %v775_v30 = vadd.f32 %v774_v28, %v732_v24  ;;  %v785_v39 = vmul.f32 0.2, %v773_v31  ;;  %vm781_vm2 = vcmp.gt.f32.partialorder %v773_v31, 0.0 }
 0x146   :  { %v776_v32 = vpop.f32.mrf.mxu0 }
 0x147   :  { %v777_v34 = vadd.f32 %v776_v32, %v734_v29  ;;  %v786_v36 = vmul.f32 0.2, %v775_v30  ;;  %vm782_vm1 = vcmp.gt.f32.partialorder %v775_v30, 0.0  ;;  %v789_v44 = vsel %vm781_vm2, %v773_v31, %v785_v39 }
 0x148   :  { %v778_v35 = vpop.f32.mrf.mxu0 }
 0x149   :  { %vm783_vm0 = vcmp.gt.f32.partialorder %v777_v34, 0.0  ;;  %v787_v37 = vmul.f32 0.2, %v777_v34  ;;  %v779_v38 = vadd.f32 %v778_v35, %v736_v33  ;;  %v790_v42 = vsel %vm782_vm1, %v775_v30, %v786_v36 }
 0x14b   :  { %vm784_vm3 = vcmp.gt.f32.partialorder %v779_v38, 0.0  ;;  %v788_v40 = vmul.f32 0.2, %v779_v38  ;;  %v791_v41 = vsel %vm783_vm0, %v777_v34, %v787_v37 }
 0x14c   :  { %v793_v46 = vpack.c.bf16 %v791_v41, %v789_v44 }
 0x14d   :  { %v792_v43 = vsel %vm784_vm3, %v779_v38, %v788_v40 }
 0x14e   :  { %v794_v45 = vpack.c.bf16 %v792_v43, %v790_v42 }
 0x150   :  { %1031 = vmatprep.mubr.bf16.mxu1 %v794_v45 }
 0x151   :  { %1032 = vmatmul.mubr.bf16.vlgmr.msra.gmra.mxu1 %v793_v46 }
 0x211   :  { %v1033_v51 = vpop.f32.mrf.mxu1 }
 0x212   :  { %v1034_v52 = vadd.f32 %v1033_v51, %v832_v49 }
 0x213   :  { %v1035_v54 = vpop.f32.mrf.mxu1 }
 0x214   :  { %vm1042_vm4 = vcmp.gt.f32.partialorder %v1034_v52, 0.0  ;;  %v1046_v55 = vmul.f32 0.2, %v1034_v52  ;;  %v1036_v56 = vadd.f32 %v1035_v54, %v836_v50 }
 0x215   :  { %v1037_v57 = vpop.f32.mrf.mxu1 }
 0x216   :  { %vm1043_vm5 = vcmp.gt.f32.partialorder %v1036_v56, 0.0  ;;  %v1047_v60 = vmul.f32 0.2, %v1036_v56  ;;  %v1038_v61 = vadd.f32 %v1037_v57, %v832_v49  ;;  %v1050_v62 = vsel %vm1042_vm4, %v1034_v52, %v1046_v55 }
 0x217   :  { %v1039_v63 = vpop.f32.mrf.mxu1  ;;  %v1066_v3 = vmul.f32 %v1059_v58, %v1050_v62 }
 0x218   :  { %vm1044_vm6 = vcmp.gt.f32.partialorder %v1038_v61, 0.0  ;;  %v1048_v0 = vmul.f32 0.2, %v1038_v61  ;;  %v1040_v1 = vadd.f32 %v1039_v63, %v836_v50  ;;  %v1051_v2 = vsel %vm1043_vm5, %v1036_v56, %v1047_v60 }
 0x219   :  { %v1067_v4 = vmul.f32 %v1063_v59, %v1051_v2 }
 0x21a   :  { %vm1045_vm7 = vcmp.gt.f32.partialorder %v1040_v1, 0.0  ;;  %v1049_v5 = vmul.f32 0.2, %v1040_v1  ;;  %v1052_v6 = vsel %vm1044_vm6, %v1038_v61, %v1048_v0 }
 0x21b   :  { %v1070_v7 = vadd.f32 %v1067_v4, %v1066_v3  ;;  %v1068_v10 = vmul.f32 %v1059_v58, %v1052_v6 }
 0x21c   :  { %v1053_v8 = vsel %vm1045_vm7, %v1040_v1, %v1049_v5 }
 0x21d   :  { %1071 = vadd.xlane.f32.xlu0 %v1070_v7  ;;  %v1069_v11 = vmul.f32 %v1063_v59, %v1053_v8 }
 0x21f   :  { %v1073_v9 = vadd.f32 %v1069_v11, %v1068_v10 }
 0x221   :  { %1074 = vadd.xlane.f32.xlu0 %v1073_v9 }
 0x2a6   :  { %v1072_v13 = vpop.xlane.xlu0 %1071 }
 0x2a7   :  { %v1083_v14 = vadd.f32 %v1238_v12, %v1072_v13 }
 0x2a9   :  { %v1239_v15 = vmul.f32 -1.442695, %v1083_v14 }
 0x2aa   :  { %v1075_v16 = vpop.xlane.xlu0 %1074 }
 0x2ab   :  { %1442 = vpow2.f32 %v1239_v15  ;;  %v1084_v17 = vadd.f32 %v1238_v12, %v1075_v16 }
 0x2ad   :  { %v1240_v18 = vmul.f32 -1.442695, %v1084_v17 }
 0x2af   :  { %1444 = vpow2.f32 %v1240_v18 }
 0x2b8   :  { %v1443_v19 = vpop.eup %1442 }
 0x2b9   :  { %v1091_v20 = vadd.f32 1.0, %v1443_v19 }
 0x2bb   :  { %1446 = vrcp.f32 %v1091_v20 }
 0x2bc   :  { %v1445_v21 = vpop.eup %1444 }
 0x2bd   :  { %v1092_v22 = vadd.f32 1.0, %v1445_v21 }
 0x2bf   :  { %1448 = vrcp.f32 %v1092_v22 }
 0x2c8   :  { %v1447_v23 = vpop.eup %1446 }
 0x2c9   :  { %1098 = vst.msk [vmem:[%s1917_s7] sm:$0xff] %vm1097_vm8, %v1447_v23 }
 0x2cc   :  { %v1449_v24 = vpop.eup %1448 }
 0x2cd   :  { %1099 = vst.msk [vmem:[%s1917_s7 + $0x8] sm:$0xff] %vm1097_vm8, %v1449_v24 }

</bundles_post_ra>
